<compile_context>
chip_gen: v6e
topology: v6e:2x2x1
jax: 0.10.0
libtpu: 0.0.40
codegen_flags: <defaults>
</compile_context>

<pallas_src>
import functools

import jax
import jax.numpy as jnp
from jax.experimental import pallas as pl
from jax.experimental.pallas import tpu as pltpu


def _attn_kernel(x_ref, wq_ref, wk_ref, wv_ref, wout_ref, bout_ref, o_ref,
                 *, heads, dim_head, scale):
    """One (Bt, N, D) batch tile per grid step.

    x_ref    : (Bt, N, D)        VMEM, bf16
    wq/wk/wv : (D, inner)        VMEM, bf16
    wout_ref : (heads, dh, D)    VMEM, bf16
    bout_ref : (1, D)            VMEM, f32
    o_ref    : (Bt, N, D)        VMEM, f32
    """
    Bt, N, D = x_ref.shape
    rows = Bt * N

    # Flatten batch*tokens into the MXU M dimension (leading-dim merge only;
    # the lane dim D is untouched).
    x2 = x_ref[...].reshape(rows, D)

    # QKV projections: three separate matmuls -> each result lane-contiguous.
    # bf16 operands, f32 accumulation on the MXU.  Scale is folded into Q
    # right at the f32->bf16 cast (cheaper than scaling the (N, N) scores).
    q2 = (jnp.dot(x2, wq_ref[...], preferred_element_type=jnp.float32)
          * scale).astype(jnp.bfloat16)
    k2 = jnp.dot(x2, wk_ref[...],
                 preferred_element_type=jnp.float32).astype(jnp.bfloat16)
    v2 = jnp.dot(x2, wv_ref[...],
                 preferred_element_type=jnp.float32).astype(jnp.bfloat16)

    acc = None  # f32 (rows, D) accumulator for the fused output projection.
    for h in range(heads):  # static unroll; heads is small
        lo = h * dim_head
        qh = q2[:, lo:lo + dim_head].reshape(Bt, N, dim_head)
        kh = k2[:, lo:lo + dim_head].reshape(Bt, N, dim_head)
        vh = v2[:, lo:lo + dim_head].reshape(Bt, N, dim_head)

        # Scaled dot-product attention, batched over the Bt batch elements.
        # No explicit transpose: contract matching last dims.
        dots = jnp.einsum('bqd,bkd->bqk', qh, kh,
                          preferred_element_type=jnp.float32)
        dots = dots - jnp.max(dots, axis=-1, keepdims=True)
        p = jnp.exp(dots)
        inv_l = pl.reciprocal(jnp.sum(p, axis=-1, keepdims=True), approx=True)
        attn = (p * inv_l).astype(jnp.bfloat16)

        ctx = jnp.einsum('bqk,bkd->bqd', attn, vh,
                         preferred_element_type=jnp.float32)  # (Bt, N, dh) f32

        # Fused output projection: accumulate this head's contribution directly
        # (no concatenated ctx scratch, no narrow masked stores).
        ctx2 = ctx.reshape(rows, dim_head).astype(jnp.bfloat16)
        contrib = jnp.dot(ctx2, wout_ref[h],
                          preferred_element_type=jnp.float32)  # (rows, D) f32
        acc = contrib if acc is None else acc + contrib

    out2 = acc + bout_ref[...]          # broadcast (1, D) bias
    # Dropout(p=0.0) == identity in the forward pass.
    o_ref[...] = out2.reshape(Bt, N, D).astype(o_ref.dtype)


def _pick_batch_tile(B, N):
    """Batch elements per grid step: aim for ~256 rows per step (fill the MXU
    M dim) but keep >= 2 grid steps when possible (dual-TC v7x occupancy)."""
    target = max(1, 256 // max(N, 1))
    bt = 1
    for cand in range(1, B + 1):
        if B % cand == 0 and cand <= target:
            bt = cand
    if bt > 1 and B // bt < 2:
        for cand in range(bt - 1, 0, -1):
            if B % cand == 0 and B // cand >= 2:
                bt = cand
                break
    return bt


def point_cloud_transformer(x, w_qkv, w_out, b_out, *, heads, dim_head,
                            batch_tile=None):
    """x: (B, N, D) float32; w_qkv: (D, 3*inner); w_out: (inner, D);
    b_out: (1, D). Returns (B, N, D) float32."""
    B, N, D = x.shape
    inner = heads * dim_head
    assert w_qkv.shape == (D, 3 * inner)
    assert w_out.shape == (inner, D)
    assert b_out.shape == (1, D)
    scale = dim_head ** (-0.5)

    Bt = batch_tile or _pick_batch_tile(B, N)
    assert B % Bt == 0

    # Wrapper-side layout plumbing (not part of the kernel's hot path):
    # split fused QKV, head-split W_out, cast matmul operands to bf16.
    wq = w_qkv[:, 0 * inner:1 * inner].astype(jnp.bfloat16)
    wk = w_qkv[:, 1 * inner:2 * inner].astype(jnp.bfloat16)
    wv = w_qkv[:, 2 * inner:3 * inner].astype(jnp.bfloat16)
    wo = w_out.reshape(heads, dim_head, D).astype(jnp.bfloat16)
    bo = b_out.astype(jnp.float32)
    xb = x.astype(jnp.bfloat16)

    kernel = functools.partial(
        _attn_kernel, heads=heads, dim_head=dim_head, scale=scale)

    # Weight index_maps are constant across the grid, so their blocks are only
    # fetched once.
    return pl.pallas_call(
        kernel,
        out_shape=jax.ShapeDtypeStruct((B, N, D), x.dtype),
        grid_spec=pltpu.PrefetchScalarGridSpec(
            num_scalar_prefetch=0,
            grid=(B // Bt,),
            in_specs=[
                pl.BlockSpec((Bt, N, D), lambda b: (b, 0, 0)),
                pl.BlockSpec((D, inner), lambda b: (0, 0)),
                pl.BlockSpec((D, inner), lambda b: (0, 0)),
                pl.BlockSpec((D, inner), lambda b: (0, 0)),
                pl.BlockSpec((heads, dim_head, D), lambda b: (0, 0, 0)),
                pl.BlockSpec((1, D), lambda b: (0, 0)),
            ],
            out_specs=pl.BlockSpec((Bt, N, D), lambda b: (b, 0, 0)),
        ),
        compiler_params=pltpu.CompilerParams(
            dimension_semantics=("parallel",)),
    )(xb, wq, wk, wv, wo, bo)


def reference(x, w_qkv, w_out, b_out, *, heads, dim_head):
    """Pure-JAX (f32) reference mirroring the PyTorch forward."""
    B, N, D = x.shape
    inner = heads * dim_head
    scale = dim_head ** (-0.5)
    qkv = jnp.einsum('bnd,de->bne', x, w_qkv)
    q, k, v = jnp.split(qkv, 3, axis=-1)

    def split_heads(t):  # b n (h d) -> b h n d
        return t.reshape(B, N, heads, dim_head).transpose(0, 2, 1, 3)

    q, k, v = map(split_heads, (q, k, v))
    dots = jnp.einsum('bhid,bhjd->bhij', q, k) * scale
    attn = jax.nn.softmax(dots, axis=-1)
    out = jnp.einsum('bhij,bhjd->bhid', attn, v)
    out = out.transpose(0, 2, 1, 3).reshape(B, N, inner)  # b h n d -> b n (h d)
    return jnp.einsum('bni,id->bnd', out, w_out) + b_out[0]


if __name__ == "__main__":
    # Small shapes consistent with the module's forward.
    B, N, DIM = 2, 8, 32
    HEADS, DIM_HEAD = 4, 16
    INNER = HEADS * DIM_HEAD

    key = jax.random.PRNGKey(0)
    kx, kqkv, kout, kb = jax.random.split(key, 4)

    x = jax.random.normal(kx, (B, N, DIM), dtype=jnp.float32)
    w_qkv = jax.random.normal(kqkv, (DIM, 3 * INNER), dtype=jnp.float32) * 0.05
    w_out = jax.random.normal(kout, (INNER, DIM), dtype=jnp.float32) * 0.05
    b_out = jax.random.normal(kb, (1, DIM), dtype=jnp.float32) * 0.01

    y = point_cloud_transformer(x, w_qkv, w_out, b_out,
                                heads=HEADS, dim_head=DIM_HEAD)
    y = jax.block_until_ready(y)

    y_ref = reference(x, w_qkv, w_out, b_out, heads=HEADS, dim_head=DIM_HEAD)
    assert y.shape == (B, N, DIM)
    # bf16 matmul operands + approx reciprocal vs. an f32 reference -> loosened
    # tolerance (observed error is ~1e-3 at these magnitudes).
    err = jnp.max(jnp.abs(y - y_ref))
    assert jnp.allclose(y, y_ref, atol=2e-2, rtol=2e-2), f"max abs err = {err}"

    print("KERNEL_OK")
</pallas_src>

<mosaic_0001>
module attributes {stable_mosaic.version = 11 : i64} {
  func.func @_attn_kernel(%arg0: i32, %arg1: memref<1x8x32xbf16, #tpu.memory_space<vmem>>, %arg2: memref<32x64xbf16, #tpu.memory_space<vmem>>, %arg3: memref<32x64xbf16, #tpu.memory_space<vmem>>, %arg4: memref<32x64xbf16, #tpu.memory_space<vmem>>, %arg5: memref<4x16x32xbf16, #tpu.memory_space<vmem>>, %arg6: memref<1x32xf32, #tpu.memory_space<vmem>>, %arg7: memref<1x8x32xf32, #tpu.memory_space<vmem>>) attributes {dimension_semantics = [#tpu.dimension_semantics<parallel>], iteration_bounds = array<i64: 2>, scalar_prefetch = 0 : i64, scratch_operands = 0 : i64, tpu.core_type = #tpu.core_type<tc>, window_params = [{transform_indices = @transform_0, window_bounds = array<i64: 1, 8, 32>}, {pipeline_mode = #tpu.pipeline_mode<synchronous>, transform_indices = @transform_1, window_bounds = array<i64: 32, 64>}, {pipeline_mode = #tpu.pipeline_mode<synchronous>, transform_indices = @transform_2, window_bounds = array<i64: 32, 64>}, {pipeline_mode = #tpu.pipeline_mode<synchronous>, transform_indices = @transform_3, window_bounds = array<i64: 32, 64>}, {pipeline_mode = #tpu.pipeline_mode<synchronous>, transform_indices = @transform_4, window_bounds = array<i64: 4, 16, 32>}, {pipeline_mode = #tpu.pipeline_mode<synchronous>, transform_indices = @transform_5, window_bounds = array<i64: 1, 32>}, {transform_indices = @transform_6, window_bounds = array<i64: 1, 8, 32>}]} {
    %c0 = arith.constant 0 : index
    %c0_0 = arith.constant 0 : index
    %c0_1 = arith.constant 0 : index
    %0 = vector.load %arg1[%c0, %c0_0, %c0_1] : memref<1x8x32xbf16, #tpu.memory_space<vmem>>, vector<1x8x32xbf16>
    %1 = vector.shape_cast %0 : vector<1x8x32xbf16> to vector<8x32xbf16>
    %c0_2 = arith.constant 0 : index
    %c0_3 = arith.constant 0 : index
    %2 = vector.load %arg2[%c0_2, %c0_3] : memref<32x64xbf16, #tpu.memory_space<vmem>>, vector<32x64xbf16>
    %cst = arith.constant dense<0.000000e+00> : vector<8x64xf32>
    %3 = tpu.matmul %1, %2, %cst {dimension_numbers = #tpu.dot_dimension_numbers<[1], [0], [0], [1], [0, 0, 1, 1], [], []>} : vector<8x32xbf16>, vector<32x64xbf16>, vector<8x64xf32> -> vector<8x64xf32>
    %cst_4 = arith.constant 2.500000e-01 : f32
    %4 = vector.broadcast %cst_4 : f32 to vector<8x64xf32>
    %5 = arith.mulf %3, %4 : vector<8x64xf32>
    %6 = arith.truncf %5 : vector<8x64xf32> to vector<8x64xbf16>
    %c0_5 = arith.constant 0 : index
    %c0_6 = arith.constant 0 : index
    %7 = vector.load %arg3[%c0_5, %c0_6] : memref<32x64xbf16, #tpu.memory_space<vmem>>, vector<32x64xbf16>
    %cst_7 = arith.constant dense<0.000000e+00> : vector<8x64xf32>
    %8 = tpu.matmul %1, %7, %cst_7 {dimension_numbers = #tpu.dot_dimension_numbers<[1], [0], [0], [1], [0, 0, 1, 1], [], []>} : vector<8x32xbf16>, vector<32x64xbf16>, vector<8x64xf32> -> vector<8x64xf32>
    %9 = arith.truncf %8 : vector<8x64xf32> to vector<8x64xbf16>
    %c0_8 = arith.constant 0 : index
    %c0_9 = arith.constant 0 : index
    %10 = vector.load %arg4[%c0_8, %c0_9] : memref<32x64xbf16, #tpu.memory_space<vmem>>, vector<32x64xbf16>
    %cst_10 = arith.constant dense<0.000000e+00> : vector<8x64xf32>
    %11 = tpu.matmul %1, %10, %cst_10 {dimension_numbers = #tpu.dot_dimension_numbers<[1], [0], [0], [1], [0, 0, 1, 1], [], []>} : vector<8x32xbf16>, vector<32x64xbf16>, vector<8x64xf32> -> vector<8x64xf32>
    %12 = arith.truncf %11 : vector<8x64xf32> to vector<8x64xbf16>
    %13 = vector.extract_strided_slice %6 {offsets = [0, 0], sizes = [8, 16], strides = [1, 1]} : vector<8x64xbf16> to vector<8x16xbf16>
    %14 = vector.shape_cast %13 : vector<8x16xbf16> to vector<1x8x16xbf16>
    %15 = vector.extract_strided_slice %9 {offsets = [0, 0], sizes = [8, 16], strides = [1, 1]} : vector<8x64xbf16> to vector<8x16xbf16>
    %16 = vector.shape_cast %15 : vector<8x16xbf16> to vector<1x8x16xbf16>
    %17 = vector.extract_strided_slice %12 {offsets = [0, 0], sizes = [8, 16], strides = [1, 1]} : vector<8x64xbf16> to vector<8x16xbf16>
    %18 = vector.shape_cast %17 : vector<8x16xbf16> to vector<1x8x16xbf16>
    "tpu.trace_start"() <{level = 10 : i32, message = "bqd,bkd->bqk"}> : () -> ()
    %cst_11 = arith.constant dense<0.000000e+00> : vector<1x8x8xf32>
    %19 = tpu.matmul %14, %16, %cst_11 {dimension_numbers = #tpu.dot_dimension_numbers<[2], [2], [1], [1], [0, 0, 0, 1, 1, 1], [0], [0]>} : vector<1x8x16xbf16>, vector<1x8x16xbf16>, vector<1x8x8xf32> -> vector<1x8x8xf32>
    "tpu.trace_stop"() : () -> ()
    %cst_12 = arith.constant dense<0xFF800000> : vector<1x8xf32>
    %20 = vector.multi_reduction <maximumf>, %19, %cst_12 [2] : vector<1x8x8xf32> to vector<1x8xf32>
    %21 = vector.shape_cast %20 : vector<1x8xf32> to vector<1x8x1xf32>
    %22 = vector.broadcast %21 : vector<1x8x1xf32> to vector<1x8x8xf32>
    %23 = arith.subf %19, %22 : vector<1x8x8xf32>
    %24 = math.exp %23 : vector<1x8x8xf32>
    %cst_13 = arith.constant dense<0.000000e+00> : vector<1x8xf32>
    %25 = vector.multi_reduction <add>, %24, %cst_13 [2] : vector<1x8x8xf32> to vector<1x8xf32>
    %26 = vector.shape_cast %25 : vector<1x8xf32> to vector<1x8x1xf32>
    %27 = tpu.reciprocal %26 {approx = true} : vector<1x8x1xf32> -> vector<1x8x1xf32>
    %28 = vector.broadcast %27 : vector<1x8x1xf32> to vector<1x8x8xf32>
    %29 = arith.mulf %24, %28 : vector<1x8x8xf32>
    %30 = arith.truncf %29 : vector<1x8x8xf32> to vector<1x8x8xbf16>
    "tpu.trace_start"() <{level = 10 : i32, message = "bqk,bkd->bqd"}> : () -> ()
    %cst_14 = arith.constant dense<0.000000e+00> : vector<1x8x16xf32>
    %31 = tpu.matmul %30, %18, %cst_14 {dimension_numbers = #tpu.dot_dimension_numbers<[2], [1], [1], [2], [0, 0, 0, 1, 1, 2], [0], [0]>} : vector<1x8x8xbf16>, vector<1x8x16xbf16>, vector<1x8x16xf32> -> vector<1x8x16xf32>
    "tpu.trace_stop"() : () -> ()
    %32 = vector.shape_cast %31 : vector<1x8x16xf32> to vector<8x16xf32>
    %33 = arith.truncf %32 : vector<8x16xf32> to vector<8x16xbf16>
    %c0_15 = arith.constant 0 : index
    %c0_16 = arith.constant 0 : index
    %c0_17 = arith.constant 0 : index
    %34 = vector.load %arg5[%c0_15, %c0_16, %c0_17] : memref<4x16x32xbf16, #tpu.memory_space<vmem>>, vector<1x16x32xbf16>
    %35 = vector.shape_cast %34 : vector<1x16x32xbf16> to vector<16x32xbf16>
    %cst_18 = arith.constant dense<0.000000e+00> : vector<8x32xf32>
    %36 = tpu.matmul %33, %35, %cst_18 {dimension_numbers = #tpu.dot_dimension_numbers<[1], [0], [0], [1], [0, 0, 1, 1], [], []>} : vector<8x16xbf16>, vector<16x32xbf16>, vector<8x32xf32> -> vector<8x32xf32>
    %37 = vector.extract_strided_slice %6 {offsets = [0, 16], sizes = [8, 16], strides = [1, 1]} : vector<8x64xbf16> to vector<8x16xbf16>
    %38 = vector.shape_cast %37 : vector<8x16xbf16> to vector<1x8x16xbf16>
    %39 = vector.extract_strided_slice %9 {offsets = [0, 16], sizes = [8, 16], strides = [1, 1]} : vector<8x64xbf16> to vector<8x16xbf16>
    %40 = vector.shape_cast %39 : vector<8x16xbf16> to vector<1x8x16xbf16>
    %41 = vector.extract_strided_slice %12 {offsets = [0, 16], sizes = [8, 16], strides = [1, 1]} : vector<8x64xbf16> to vector<8x16xbf16>
    %42 = vector.shape_cast %41 : vector<8x16xbf16> to vector<1x8x16xbf16>
    "tpu.trace_start"() <{level = 10 : i32, message = "bqd,bkd->bqk"}> : () -> ()
    %cst_19 = arith.constant dense<0.000000e+00> : vector<1x8x8xf32>
    %43 = tpu.matmul %38, %40, %cst_19 {dimension_numbers = #tpu.dot_dimension_numbers<[2], [2], [1], [1], [0, 0, 0, 1, 1, 1], [0], [0]>} : vector<1x8x16xbf16>, vector<1x8x16xbf16>, vector<1x8x8xf32> -> vector<1x8x8xf32>
    "tpu.trace_stop"() : () -> ()
    %cst_20 = arith.constant dense<0xFF800000> : vector<1x8xf32>
    %44 = vector.multi_reduction <maximumf>, %43, %cst_20 [2] : vector<1x8x8xf32> to vector<1x8xf32>
    %45 = vector.shape_cast %44 : vector<1x8xf32> to vector<1x8x1xf32>
    %46 = vector.broadcast %45 : vector<1x8x1xf32> to vector<1x8x8xf32>
    %47 = arith.subf %43, %46 : vector<1x8x8xf32>
    %48 = math.exp %47 : vector<1x8x8xf32>
    %cst_21 = arith.constant dense<0.000000e+00> : vector<1x8xf32>
    %49 = vector.multi_reduction <add>, %48, %cst_21 [2] : vector<1x8x8xf32> to vector<1x8xf32>
    %50 = vector.shape_cast %49 : vector<1x8xf32> to vector<1x8x1xf32>
    %51 = tpu.reciprocal %50 {approx = true} : vector<1x8x1xf32> -> vector<1x8x1xf32>
    %52 = vector.broadcast %51 : vector<1x8x1xf32> to vector<1x8x8xf32>
    %53 = arith.mulf %48, %52 : vector<1x8x8xf32>
    %54 = arith.truncf %53 : vector<1x8x8xf32> to vector<1x8x8xbf16>
    "tpu.trace_start"() <{level = 10 : i32, message = "bqk,bkd->bqd"}> : () -> ()
    %cst_22 = arith.constant dense<0.000000e+00> : vector<1x8x16xf32>
    %55 = tpu.matmul %54, %42, %cst_22 {dimension_numbers = #tpu.dot_dimension_numbers<[2], [1], [1], [2], [0, 0, 0, 1, 1, 2], [0], [0]>} : vector<1x8x8xbf16>, vector<1x8x16xbf16>, vector<1x8x16xf32> -> vector<1x8x16xf32>
    "tpu.trace_stop"() : () -> ()
    %56 = vector.shape_cast %55 : vector<1x8x16xf32> to vector<8x16xf32>
    %57 = arith.truncf %56 : vector<8x16xf32> to vector<8x16xbf16>
    %c1 = arith.constant 1 : index
    %c0_23 = arith.constant 0 : index
    %c0_24 = arith.constant 0 : index
    %58 = vector.load %arg5[%c1, %c0_23, %c0_24] : memref<4x16x32xbf16, #tpu.memory_space<vmem>>, vector<1x16x32xbf16>
    %59 = vector.shape_cast %58 : vector<1x16x32xbf16> to vector<16x32xbf16>
    %cst_25 = arith.constant dense<0.000000e+00> : vector<8x32xf32>
    %60 = tpu.matmul %57, %59, %cst_25 {dimension_numbers = #tpu.dot_dimension_numbers<[1], [0], [0], [1], [0, 0, 1, 1], [], []>} : vector<8x16xbf16>, vector<16x32xbf16>, vector<8x32xf32> -> vector<8x32xf32>
    %61 = arith.addf %36, %60 : vector<8x32xf32>
    %62 = vector.extract_strided_slice %6 {offsets = [0, 32], sizes = [8, 16], strides = [1, 1]} : vector<8x64xbf16> to vector<8x16xbf16>
    %63 = vector.shape_cast %62 : vector<8x16xbf16> to vector<1x8x16xbf16>
    %64 = vector.extract_strided_slice %9 {offsets = [0, 32], sizes = [8, 16], strides = [1, 1]} : vector<8x64xbf16> to vector<8x16xbf16>
    %65 = vector.shape_cast %64 : vector<8x16xbf16> to vector<1x8x16xbf16>
    %66 = vector.extract_strided_slice %12 {offsets = [0, 32], sizes = [8, 16], strides = [1, 1]} : vector<8x64xbf16> to vector<8x16xbf16>
    %67 = vector.shape_cast %66 : vector<8x16xbf16> to vector<1x8x16xbf16>
    "tpu.trace_start"() <{level = 10 : i32, message = "bqd,bkd->bqk"}> : () -> ()
    %cst_26 = arith.constant dense<0.000000e+00> : vector<1x8x8xf32>
    %68 = tpu.matmul %63, %65, %cst_26 {dimension_numbers = #tpu.dot_dimension_numbers<[2], [2], [1], [1], [0, 0, 0, 1, 1, 1], [0], [0]>} : vector<1x8x16xbf16>, vector<1x8x16xbf16>, vector<1x8x8xf32> -> vector<1x8x8xf32>
    "tpu.trace_stop"() : () -> ()
    %cst_27 = arith.constant dense<0xFF800000> : vector<1x8xf32>
    %69 = vector.multi_reduction <maximumf>, %68, %cst_27 [2] : vector<1x8x8xf32> to vector<1x8xf32>
    %70 = vector.shape_cast %69 : vector<1x8xf32> to vector<1x8x1xf32>
    %71 = vector.broadcast %70 : vector<1x8x1xf32> to vector<1x8x8xf32>
    %72 = arith.subf %68, %71 : vector<1x8x8xf32>
    %73 = math.exp %72 : vector<1x8x8xf32>
    %cst_28 = arith.constant dense<0.000000e+00> : vector<1x8xf32>
    %74 = vector.multi_reduction <add>, %73, %cst_28 [2] : vector<1x8x8xf32> to vector<1x8xf32>
    %75 = vector.shape_cast %74 : vector<1x8xf32> to vector<1x8x1xf32>
    %76 = tpu.reciprocal %75 {approx = true} : vector<1x8x1xf32> -> vector<1x8x1xf32>
    %77 = vector.broadcast %76 : vector<1x8x1xf32> to vector<1x8x8xf32>
    %78 = arith.mulf %73, %77 : vector<1x8x8xf32>
    %79 = arith.truncf %78 : vector<1x8x8xf32> to vector<1x8x8xbf16>
    "tpu.trace_start"() <{level = 10 : i32, message = "bqk,bkd->bqd"}> : () -> ()
    %cst_29 = arith.constant dense<0.000000e+00> : vector<1x8x16xf32>
    %80 = tpu.matmul %79, %67, %cst_29 {dimension_numbers = #tpu.dot_dimension_numbers<[2], [1], [1], [2], [0, 0, 0, 1, 1, 2], [0], [0]>} : vector<1x8x8xbf16>, vector<1x8x16xbf16>, vector<1x8x16xf32> -> vector<1x8x16xf32>
    "tpu.trace_stop"() : () -> ()
    %81 = vector.shape_cast %80 : vector<1x8x16xf32> to vector<8x16xf32>
    %82 = arith.truncf %81 : vector<8x16xf32> to vector<8x16xbf16>
    %c2 = arith.constant 2 : index
    %c0_30 = arith.constant 0 : index
    %c0_31 = arith.constant 0 : index
    %83 = vector.load %arg5[%c2, %c0_30, %c0_31] : memref<4x16x32xbf16, #tpu.memory_space<vmem>>, vector<1x16x32xbf16>
    %84 = vector.shape_cast %83 : vector<1x16x32xbf16> to vector<16x32xbf16>
    %cst_32 = arith.constant dense<0.000000e+00> : vector<8x32xf32>
    %85 = tpu.matmul %82, %84, %cst_32 {dimension_numbers = #tpu.dot_dimension_numbers<[1], [0], [0], [1], [0, 0, 1, 1], [], []>} : vector<8x16xbf16>, vector<16x32xbf16>, vector<8x32xf32> -> vector<8x32xf32>
    %86 = arith.addf %61, %85 : vector<8x32xf32>
    %87 = vector.extract_strided_slice %6 {offsets = [0, 48], sizes = [8, 16], strides = [1, 1]} : vector<8x64xbf16> to vector<8x16xbf16>
    %88 = vector.shape_cast %87 : vector<8x16xbf16> to vector<1x8x16xbf16>
    %89 = vector.extract_strided_slice %9 {offsets = [0, 48], sizes = [8, 16], strides = [1, 1]} : vector<8x64xbf16> to vector<8x16xbf16>
    %90 = vector.shape_cast %89 : vector<8x16xbf16> to vector<1x8x16xbf16>
    %91 = vector.extract_strided_slice %12 {offsets = [0, 48], sizes = [8, 16], strides = [1, 1]} : vector<8x64xbf16> to vector<8x16xbf16>
    %92 = vector.shape_cast %91 : vector<8x16xbf16> to vector<1x8x16xbf16>
    "tpu.trace_start"() <{level = 10 : i32, message = "bqd,bkd->bqk"}> : () -> ()
    %cst_33 = arith.constant dense<0.000000e+00> : vector<1x8x8xf32>
    %93 = tpu.matmul %88, %90, %cst_33 {dimension_numbers = #tpu.dot_dimension_numbers<[2], [2], [1], [1], [0, 0, 0, 1, 1, 1], [0], [0]>} : vector<1x8x16xbf16>, vector<1x8x16xbf16>, vector<1x8x8xf32> -> vector<1x8x8xf32>
    "tpu.trace_stop"() : () -> ()
    %cst_34 = arith.constant dense<0xFF800000> : vector<1x8xf32>
    %94 = vector.multi_reduction <maximumf>, %93, %cst_34 [2] : vector<1x8x8xf32> to vector<1x8xf32>
    %95 = vector.shape_cast %94 : vector<1x8xf32> to vector<1x8x1xf32>
    %96 = vector.broadcast %95 : vector<1x8x1xf32> to vector<1x8x8xf32>
    %97 = arith.subf %93, %96 : vector<1x8x8xf32>
    %98 = math.exp %97 : vector<1x8x8xf32>
    %cst_35 = arith.constant dense<0.000000e+00> : vector<1x8xf32>
    %99 = vector.multi_reduction <add>, %98, %cst_35 [2] : vector<1x8x8xf32> to vector<1x8xf32>
    %100 = vector.shape_cast %99 : vector<1x8xf32> to vector<1x8x1xf32>
    %101 = tpu.reciprocal %100 {approx = true} : vector<1x8x1xf32> -> vector<1x8x1xf32>
    %102 = vector.broadcast %101 : vector<1x8x1xf32> to vector<1x8x8xf32>
    %103 = arith.mulf %98, %102 : vector<1x8x8xf32>
    %104 = arith.truncf %103 : vector<1x8x8xf32> to vector<1x8x8xbf16>
    "tpu.trace_start"() <{level = 10 : i32, message = "bqk,bkd->bqd"}> : () -> ()
    %cst_36 = arith.constant dense<0.000000e+00> : vector<1x8x16xf32>
    %105 = tpu.matmul %104, %92, %cst_36 {dimension_numbers = #tpu.dot_dimension_numbers<[2], [1], [1], [2], [0, 0, 0, 1, 1, 2], [0], [0]>} : vector<1x8x8xbf16>, vector<1x8x16xbf16>, vector<1x8x16xf32> -> vector<1x8x16xf32>
    "tpu.trace_stop"() : () -> ()
    %106 = vector.shape_cast %105 : vector<1x8x16xf32> to vector<8x16xf32>
    %107 = arith.truncf %106 : vector<8x16xf32> to vector<8x16xbf16>
    %c3 = arith.constant 3 : index
    %c0_37 = arith.constant 0 : index
    %c0_38 = arith.constant 0 : index
    %108 = vector.load %arg5[%c3, %c0_37, %c0_38] : memref<4x16x32xbf16, #tpu.memory_space<vmem>>, vector<1x16x32xbf16>
    %109 = vector.shape_cast %108 : vector<1x16x32xbf16> to vector<16x32xbf16>
    %cst_39 = arith.constant dense<0.000000e+00> : vector<8x32xf32>
    %110 = tpu.matmul %107, %109, %cst_39 {dimension_numbers = #tpu.dot_dimension_numbers<[1], [0], [0], [1], [0, 0, 1, 1], [], []>} : vector<8x16xbf16>, vector<16x32xbf16>, vector<8x32xf32> -> vector<8x32xf32>
    %111 = arith.addf %86, %110 : vector<8x32xf32>
    %c0_40 = arith.constant 0 : index
    %c0_41 = arith.constant 0 : index
    %112 = vector.load %arg6[%c0_40, %c0_41] : memref<1x32xf32, #tpu.memory_space<vmem>>, vector<1x32xf32>
    %113 = vector.broadcast %112 : vector<1x32xf32> to vector<8x32xf32>
    %114 = arith.addf %111, %113 : vector<8x32xf32>
    %115 = vector.shape_cast %114 : vector<8x32xf32> to vector<1x8x32xf32>
    %c0_42 = arith.constant 0 : index
    %c0_43 = arith.constant 0 : index
    %c0_44 = arith.constant 0 : index
    %116 = vector.load %arg7[%c0_42, %c0_43, %c0_44] : memref<1x8x32xf32, #tpu.memory_space<vmem>>, vector<1x8x32xf32>
    tpu.vector_store %arg7[%c0_42, %c0_43, %c0_44], %115 {strides = array<i32>} : memref<1x8x32xf32, #tpu.memory_space<vmem>>, vector<1x8x32xf32>,
    return
  }
  func.func @transform_0(%arg0: i32) -> (i32, i32, i32) {
    %c0_i32 = arith.constant 0 : i32
    %c0_i32_0 = arith.constant 0 : i32
    %c0_i32_1 = arith.constant 0 : i32
    return %arg0, %c0_i32, %c0_i32_0 : i32, i32, i32
  }
  func.func @transform_1(%arg0: i32) -> (i32, i32) {
    %c0_i32 = arith.constant 0 : i32
    %c0_i32_0 = arith.constant 0 : i32
    %c0_i32_1 = arith.constant 0 : i32
    return %c0_i32, %c0_i32_0 : i32, i32
  }
  func.func @transform_2(%arg0: i32) -> (i32, i32) {
    %c0_i32 = arith.constant 0 : i32
    %c0_i32_0 = arith.constant 0 : i32
    %c0_i32_1 = arith.constant 0 : i32
    return %c0_i32, %c0_i32_0 : i32, i32
  }
  func.func @transform_3(%arg0: i32) -> (i32, i32) {
    %c0_i32 = arith.constant 0 : i32
    %c0_i32_0 = arith.constant 0 : i32
    %c0_i32_1 = arith.constant 0 : i32
    return %c0_i32, %c0_i32_0 : i32, i32
  }
  func.func @transform_4(%arg0: i32) -> (i32, i32, i32) {
    %c0_i32 = arith.constant 0 : i32
    %c0_i32_0 = arith.constant 0 : i32
    %c0_i32_1 = arith.constant 0 : i32
    %c0_i32_2 = arith.constant 0 : i32
    return %c0_i32, %c0_i32_0, %c0_i32_1 : i32, i32, i32
  }
  func.func @transform_5(%arg0: i32) -> (i32, i32) {
    %c0_i32 = arith.constant 0 : i32
    %c0_i32_0 = arith.constant 0 : i32
    %c0_i32_1 = arith.constant 0 : i32
    return %c0_i32, %c0_i32_0 : i32, i32
  }
  func.func @transform_6(%arg0: i32) -> (i32, i32, i32) {
    %c0_i32 = arith.constant 0 : i32
    %c0_i32_0 = arith.constant 0 : i32
    %c0_i32_1 = arith.constant 0 : i32
    return %arg0, %c0_i32, %c0_i32_0 : i32, i32, i32
  }
}

</mosaic_0001>

<bundles_post_ra>
// kernel: tpu_custom_call.1
= control target key start
LH: loop header
LB: loop body
LE: loop exit
PB: predicated region body
PF: predicated region fallthrough
CT: control target
= control target key end

     0   :  { %s2171_s0 = inlined_call_operand.hbm [shape: bf16[2,8,32], index: 0, kind: input, shape index: {}]   ;;  %s2172_s1 = inlined_call_operand.hbm [shape: bf16[32,64], index: 1, kind: input, shape index: {}]   ;;  %s2173_s2 = inlined_call_operand.hbm [shape: bf16[32,64], index: 2, kind: input, shape index: {}]   ;;  %s2174_s3 = inlined_call_operand.hbm [shape: bf16[32,64], index: 3, kind: input, shape index: {}]   ;;  %s2175_s4 = inlined_call_operand.hbm [shape: bf16[4,16,32], index: 4, kind: input, shape index: {}]   ;;  %s2176_s5 = inlined_call_operand.vmem [shape: f32[1,32], index: 5, kind: input, shape index: {}]   ;;  %s2177_s6 = inlined_call_operand.hbm [shape: f32[2,8,32], index: 6, kind: output, shape index: {}]  }
   0x1   :  { %2182 = sst [smem:[#allocation16_spill]] %s2172_s1 }
   0x2   :  { %11 = vsyncpa [#allocation3], 0 }
   0x3   :  { %13 = vsyncpa [#allocation3 + $0x1], 0 }
   0x4   :  { %14 = vsyncpa [#allocation6], 0 }
   0x5   :  { %15 = vsyncpa [#allocation9], 0 }
   0x6   :  { %16 = vsyncpa [#allocation4], 0 }
   0x7   :  { %18 = vsyncpa [#allocation4 + $0x1], 0  ;;  %s1836_s21 = smov 0   ;;  %s1838_s22 = smov 0  }
   0x8   :  { %s1840_s23 = smov 0   ;;  %s1842_s24 = smov 0  }
   0x9 LB: > { %s1788_s25 = smov [#allocation5]   ;;  %s1857_s27 = sadd.s32 4294967295, %s1786_s24   ;;  %s1786_s24 = sphi %s1842_s24, %s2203_s24   ;;  %s1782_s23 = sphi %s1840_s23, %s2202_s23   ;;  %s1778_s22 = sphi %s1838_s22, %s2201_s22   ;;  %s1774_s21 = sphi %s1836_s21, %s2200_s21  }
   0xa   : > { %s198_s26 = sshll.u32 %s1788_s25, 4  ;;  %p1288_p0 = scmp.ge.s32.totalorder %s1786_s24, 1  ;;  %s199_s26 = int_to_ptr.vmem [resolvable:$true] %s198_s26 }
   0xb   : > { %p2178_p1 = scmp.eq.s32.totalorder %s1857_s27, 0  ;;  %p186_p2 = scmp.lt.s32.totalorder %s1786_s24, 3 }
   0xc   : > { %s1789_s29 = smov [#allocation8]   ;;  %s1790_s8 = smov [#allocation7]  }
   0xd   : > { %p1862_p3 = pnand %p1288_p0, %p186_p2  ;;  %s224_s30 = sshll.u32 %s1789_s29, 4  ;;  %s1875_s30 = int_to_ptr.vmem [resolvable:$true] %s224_s30 }
   0xe   : > { %s211_s9 = sshll.u32 %s1790_s8, 4  ;;  %s1593_s10 = scalar_lea.vmem %s199_s26, 256  ;;  %s1877_s9 = int_to_ptr.vmem [resolvable:$true] %s211_s9 }
   0xf   : > { %s2183_s28 = scalar_select %p1862_p3, 1, 0 }
  0x10   : > { %p1482_p5 = pneg %p1862_p3  ;;  %p1594_p8 = scmp.ne.s32.totalorder %s199_s26, %s1593_s10 }
  0x11   : > { %p1601_p11 = scmp.lt.s32.totalorder %s199_s26, %s199_s26  ;;  %p1602_p12 = scmp.lt.s32.totalorder %s1593_s10, %s1593_s10 }
  0x12   : > { %p1871_p6 = pnand %p1482_p5, %p2178_p1 }
  0x13   : > { %p1603_p13 = por %p1602_p12, %p1601_p11 }
  0x14   : > { %p1584_p7 = pneg %p1871_p6 }
  0x16   : > { %p1596_p9 = pnand %p1594_p8, %p1584_p7 }
  0x18   : > { %p1597_p10 = pneg %p1596_p9 }
  0x1a   : > { %p1604_p0 = pnand %p1603_p13, %p1597_p10 }
  0x1c   : > { %1607 = shalt.err (!%p1604_p0)
}
  0x1d   : > { %s1791_s11 = smov 64   ;;  %s1792_s12 = smov 4  }
  0x1e   : > { %s2185_s1 = sld [smem:[#allocation16_spill]]  ;;  %s1619_s15 = scalar_lea.vmem %s1875_s30, 256 }
  0x1f   : > { %p1620_p2 = scmp.ne.s32.totalorder %s1875_s30, %s1619_s15  ;;  %p1627_p9 = scmp.lt.s32.totalorder %s1875_s30, %s1875_s30 }
  0x20   : > { %p1628_p10 = scmp.lt.s32.totalorder %s1619_s15, %s1619_s15 }
  0x21   : > { %p1622_p5 = pnand %p1620_p2, %p1584_p7 }
  0x22   : > { %p1629_p11 = por %p1628_p10, %p1627_p9 }
  0x23   : > { %p1623_p8 = pneg %p1622_p5 }
  0x24   : > { %1485 = dma.hbm_to_vmem [thread:$0]  (!%p1871_p6), %s2185_s1, 256, %s199_s26, [#allocation6], %s1791_s11, %s1791_s11, %s1792_s12  }
  0x25   : > { %p1630_p12 = pnand %p1629_p11, %p1623_p8 }
  0x27   : > { %1633 = shalt.err (!%p1630_p12)
}
  0x28   : > { %1491 = dma.hbm_to_vmem [thread:$0]  (!%p1871_p6), %s2174_s3, 256, %s1875_s30, [#allocation9], %s1791_s11, %s1791_s11, %s1792_s12  }
  0x29   : > { %s1645_s18 = scalar_lea.vmem %s1877_s9, 256  ;;  %p1653_p5 = scmp.lt.s32.totalorder %s1877_s9, %s1877_s9 }
  0x2a   : > { %p1646_p13 = scmp.ne.s32.totalorder %s1877_s9, %s1645_s18  ;;  %p1654_p8 = scmp.lt.s32.totalorder %s1645_s18, %s1645_s18 }
  0x2c   : > { %p1648_p0 = pnand %p1646_p13, %p1584_p7  ;;  %p1655_p9 = por %p1654_p8, %p1653_p5 }
  0x2e   : > { %p1649_p2 = pneg %p1648_p0 }
  0x30   : > { %p1656_p10 = pnand %p1655_p9, %p1649_p2 }
  0x32   : > { %1659 = shalt.err (!%p1656_p10)
}
  0x33   : > { %1488 = dma.hbm_to_vmem [thread:$0]  (!%p1871_p6), %s2173_s2, 256, %s1877_s9, [#allocation6], %s1791_s11, %s1791_s11, %s1792_s12  }
  0x34   : > { %s1793_s25 = smov [#allocation10]  }
  0x35   : > { %s237_s26 = sshll.u32 %s1793_s25, 4  ;;  %s238_s26 = int_to_ptr.vmem [resolvable:$true] %s237_s26 }
  0x36   : > { %s1671_s29 = scalar_lea.vmem %s238_s26, 512  ;;  %p1679_p0 = scmp.lt.s32.totalorder %s238_s26, %s238_s26 }
  0x37   : > { %p1672_p11 = scmp.ne.s32.totalorder %s238_s26, %s1671_s29  ;;  %p1680_p2 = scmp.lt.s32.totalorder %s1671_s29, %s1671_s29 }
  0x39   : > { %p1674_p12 = pnand %p1672_p11, %p1584_p7  ;;  %p1681_p5 = por %p1680_p2, %p1679_p0 }
  0x3b   : > { %p1675_p13 = pneg %p1674_p12 }
  0x3d   : > { %p1682_p8 = pnand %p1681_p5, %p1675_p13 }
  0x3f   : > { %1685 = shalt.err (!%p1682_p8)
}
  0x40   : > { %1494 = dma.hbm_to_vmem [thread:$0]  (!%p1871_p6), %s2175_s4, 512, %s238_s26, [#allocation9], %s1791_s11, %s1791_s11, %s1792_s12  }
  0x41   : > { %s1287_s7 = sadd.s32 4294967294, %s1786_s24   ;;  %s1937_s9 = sadd.s32 1, %s1786_s24  }
  0x42   : > { %s28_s10 = ssub.s32 %s1786_s24, %s1937_s9  ;;  %s31_s13 = sadd.s32 1, %s1782_s23 }
  0x43   : > { %p29_p7 = scmp.eq.s32.totalorder %s28_s10, 0  ;;  %p38_p9 = scmp.ne.s32.totalorder %s1782_s23, %s1778_s22 }
  0x44   : > { %p39_p10 = scmp.eq.s32.totalorder %s1786_s24, 0  ;;  %p44_p11 = scmp.ne.s32.totalorder %s1778_s22, %s1774_s21 }
  0x45   : > { %s1948_s14 = scalar_select %p29_p7, %s1782_s23, %s31_s13  }
  0x46   : > { %p1950_p12 = por %p39_p10, %p38_p9  ;;  %p1956_p6 = por %p2178_p1, %p44_p11 }
  0x47   : > { %p173_p13 = scmp.eq.s32.totalorder %s1857_s27, 1  ;;  %p179_p0 = scmp.eq.s32.totalorder %s1287_s7, 1 }
  0x48   : > { %s2187_s11 = scalar_select %p1956_p6, 1, 0 }
  0x49   : > { %p1507_p2 = scmp.lt.s32.totalorder %s1786_s24, 2  ;;  %s254_s12 = sand.u32 1, %s1782_s23  }
  0x4a   : > { %p1963_p5 = por %p173_p13, %p38_p9  ;;  %p1967_p8 = por %p179_p0, %p44_p11 }
  0x4b   : > { %s1294_s18 = sshll.u32 %s254_s12, 2  ;;  %s1295_s19 = sshll.u32 %s1786_s24, 6 }
  0x4c   : > { %s2188_s16 = scalar_select %p1963_p5, 1, 0 }
  0x4d   : > { %s2189_s17 = scalar_select %p1967_p8, 1, 0 }
  0x4e   : > { %s1975_s26 = scalar_lea.hbm %s2171_s0, %s1295_s19  ;;  %s258_s29 = scalar_lea.vmem [#allocation2], %s1294_s18 }
  0x4f   : > { %s265_s30 = sshll.u32 %s258_s29, 4  ;;  %p1979_p7 = pnand %p1507_p2, %p1950_p12  ;;  %s266_s30 = int_to_ptr.vmem [resolvable:$true] %s265_s30 }
  0x50   : > { %s255_s7 = scalar_lea.sflag [#allocation3], %s254_s12  ;;  %s1686_s10 = scalar_lea.hbm %s1975_s26, 64 }
  0x51   : > { %p1687_p9 = scmp.ne.s32.totalorder %s1975_s26, %s1686_s10  ;;  %p1688_p10 = pneg %p1979_p7 }
  0x52   : > { %s1691_s20 = scalar_lea.hbm %s2171_s0, 128  ;;  %p1692_p0 = scmp.lt.s32.totalorder %s1975_s26, %s2171_s0 }
  0x53   : > { %p1689_p11 = pnand %p1688_p10, %p1687_p9  ;;  %p1693_p12 = scmp.lt.s32.totalorder %s1691_s20, %s1686_s10 }
  0x55   : > { %p1690_p13 = pneg %p1689_p11  ;;  %p1694_p2 = por %p1693_p12, %p1692_p0 }
  0x57   : > { %p1695_p4 = pnand %p1694_p2, %p1690_p13 }
  0x59   : > { %1698 = shalt.err (!%p1695_p4)
}
  0x5a   : > { %s1699_s15 = scalar_lea.vmem %s266_s30, 64  ;;  %s1794_s12 = smov [#allocation2]  }
  0x5b   : > { %p1700_p1 = scmp.ne.s32.totalorder %s266_s30, %s1699_s15  ;;  %s1704_s29 = sshll.u32 %s1794_s12, 4  ;;  %s1705_s29 = int_to_ptr.vmem [resolvable:$false] %s1704_s29 }
  0x5c   : > { %s1706_s1 = scalar_lea.vmem %s1705_s29, 128  ;;  %p1707_p9 = scmp.lt.s32.totalorder %s266_s30, %s1705_s29 }
  0x5d   : > { %p1702_p8 = pnand %p1700_p1, %p1688_p10  ;;  %p1708_p11 = scmp.lt.s32.totalorder %s1706_s1, %s1699_s15 }
  0x5f   : > { %p1703_p5 = pneg %p1702_p8  ;;  %p1709_p6 = por %p1708_p11, %p1707_p9 }
  0x61   : > { %p1710_p3 = pnand %p1709_p6, %p1703_p5 }
  0x63   : > { %1713 = shalt.err (!%p1710_p3)
}
  0x64   : > { %1498 = dma.hbm_to_vmem [thread:$0]  (!%p1979_p7), %s1975_s26, 64, %s266_s30, %s255_s7  }
  0x65   : > { %p2191_p13 = scmp.ne.s32.totalorder %s2183_s28, 0 }
  0x66   : > { %s2000_s10 = sand.u32 (!%p2191_p13), 1, %s1778_s22   ;;  %p2192_p1 = scmp.ne.s32.totalorder (!%p2191_p13), %s2187_s11, 0 }
  0x67   : > { %274 = sbr.rel (%p2191_p13) target bundleno = 2581 (0xa15), region = 44  ;;  %s1297_s13 = sshll.u32 (!%p2191_p13), %s2000_s10, 2 }
  0x68   : > { %s277_s19 = scalar_lea.sflag (!%p2191_p13), [#allocation3], %s2000_s10  ;;  %s280_s20 = scalar_lea.vmem (!%p2191_p13), [#allocation2], %s1297_s13 }
  0x6c   : > { %1757 = dma.done.wait (%p2192_p1), %s277_s19, 64  }
  0x6d   : > { %1759 = vsyncadd (%p2192_p1), %s277_s19, 4294967232  ;;  %p2193_p3 = scmp.eq.s32.totalorder %s1857_s27, 0 }
  0x6f   : > { %1761 = dma.done.wait (%p2193_p3), [#allocation6], 512   ;;  %p2194_p4 = pmov %p2193_p3 }
  0x70   : > { %p2195_p6 = pmov %p2193_p3 }
  0x71   : > { %1763 = vsyncadd (%p2194_p4), [#allocation6], 4294966784 }
  0x72   : > { %1765 = dma.done.wait (%p2195_p6), [#allocation9], 768   ;;  %p2196_p5 = pmov %p2193_p3 }
  0x73   : > { %v1795_v0 = vmov 0.0   ;;  %vm1796_vm0 = vmmov 0   ;;  %v1556_v1 = vld [vmem:[#allocation7 + $0x8] sm:$0xff]   ;;  %v1557_v2 = vld [vmem:[#allocation5 + $0x8] sm:$0xff]   ;;  %v1558_v3 = vld [vmem:[#allocation7] sm:$0xff]   ;;  %vm343_vm1 = vcmask 261120  }
  0x74   : > { %1767 = vsyncadd (%p2196_p5), [#allocation9], 4294966528  ;;  %1374 = vmatprep.subr.bf16.mxu1 %v1795_v0  ;;  %1366 = vmatprep.subr.bf16.mxu0 %v1795_v0  ;;  %v1559_v4 = vld [vmem:[#allocation5] sm:$0xff]   ;;  %v326_v5 = vld [vmem:[%s280_s20] sm:$0xf]  ;;  %vm503_vm2 = vcmask 130048  }
  0x75   : > { %1378 = vmatprep.mubr.msk.bf16.mxu1 %vm1796_vm0, %v1795_v0  ;;  %1370 = vmatprep.mubr.msk.bf16.mxu0 %vm1796_vm0, %v1795_v0  ;;  %s1797_s1 = smov 112   ;;  %v1560_v18 = vld [vmem:[#allocation8 + $0x8] sm:$0xff]   ;;  %v1561_v19 = vld [vmem:[#allocation8] sm:$0xff]   ;;  %vm550_vm3 = vcmask 64512   ;;  %vm566_vm4 = vcmask 1043456   ;;  %s1798_s28 = smov 96  }
  0x76   : > { %1375 = vmatpush3.bf16.msra.mxu1 %v1556_v1  ;;  %1367 = vmatpush3.bf16.msra.mxu0 %v1557_v2  ;;  %v1563_v53 = vld [vmem:[#allocation10 + $0x8] sm:$0xff]   ;;  %v1562_v59 = vld [vmem:[#allocation10] sm:$0xff]   ;;  %s1799_s11 = smov 80   ;;  %s1302_s26 = sshll.u32 %s2000_s10, 3 }
  0x77   : > { %1376 = vmatprep.subr.bf16.mxu1 %v1795_v0  ;;  %1368 = vmatprep.subr.bf16.mxu0 %v1795_v0  ;;  %s1330_s7 = sshll.u32 %s1857_s27, 7  ;;  %s324_s18 = scalar_lea.vmem [#allocation11], %s1302_s26 }
  0x78   : > { %s1179_s25 = sshll.u32 %s324_s18, 4  ;;  %s2127_s29 = scalar_lea.hbm %s2177_s6, %s1330_s7  ;;  %s2129_s25 = int_to_ptr.vmem [resolvable:$true] %s1179_s25 }
  0x79   : > { %s1166_s27 = scalar_lea.sflag [#allocation4], %s2000_s10  ;;  %s1714_s13 = scalar_lea.vmem %s2129_s25, 128 }
  0x7a   : > { %1377 = vmatpush3.bf16.msra.mxu1 %v1558_v3  ;;  %1369 = vmatpush3.bf16.msra.mxu0 %v1559_v4  ;;  %p1715_p8 = scmp.ne.s32.totalorder %s2129_s25, %s1714_s13  ;;  %p2197_p7 = scmp.ne.s32.totalorder %s2188_s16, 0 }
  0x7b   : > { %1390 = vmatprep.subr.bf16.mxu1 %v1795_v0  ;;  %1382 = vmatprep.subr.bf16.mxu0 %v1795_v0  ;;  %s1800_s19 = smov [#allocation11]  }
  0x7c   : > { %p1716_p10 = pnand %p1715_p8, %p2197_p7  ;;  %s1718_s20 = sshll.u32 %s1800_s19, 4  ;;  %s1719_s20 = int_to_ptr.vmem [resolvable:$false] %s1718_s20 }
  0x7d   : > { %1379 = vmatmul.mubr.msk.bf16.vlgmr.msra.gmra.mxu1 %vm343_vm1, %v326_v5  ;;  %1371 = vmatmul.mubr.msk.bf16.vlgmr.msra.gmra.mxu0 %vm343_vm1, %v326_v5  ;;  %p1721_p12 = scmp.lt.s32.totalorder %s2129_s25, %s1719_s20 }
  0x7e   : > { %1392 = vmatprep.mubr.msk.bf16.mxu1 %vm1796_vm0, %v1795_v0  ;;  %1386 = vmatprep.mubr.msk.bf16.mxu0 %vm1796_vm0, %v1795_v0  ;;  %p1717_p0 = pneg %p1716_p10 }
  0x7f   : > { %1383 = vmatpush3.bf16.msra.mxu0 %v1560_v18 }
  0x80   : > { %1384 = vmatprep.subr.bf16.mxu0 %v1795_v0 }
  0x83   : > { %1385 = vmatpush3.bf16.msra.mxu0 %v1561_v19 }
  0x84   : > { %1396 = vmatprep.subr.bf16.mxu0 %v1795_v0 }
  0x86   : > { %1387 = vmatmul.mubr.msk.bf16.vlgmr.msra.gmra.mxu0 %vm343_vm1, %v326_v5 }
  0x87   : > { %1398 = vmatprep.mubr.msk.bf16.mxu0 %vm1796_vm0, %v1795_v0 }
 0x13d   : > { %v439_v6 = vpop.f32.mrf.mxu1  ;;  %v381_v8 = vpop.f32.mrf.mxu0 }
 0x13e   : > { %v2032_v7 = vpack.c.bf16 %v439_v6, %v439_v6  ;;  %v387_v9 = vmul.f32 0.25, %v381_v8 }
 0x13f   : > { %v1380_v10 = vpop.f32.mrf.mxu1  ;;  %v1372_v11 = vpop.f32.mrf.mxu0 }
 0x140   : > { %617 = vrot.lane.b32.xlu0 %v2032_v7, %s1797_s1  ;;  %v508_v12 = vsel %vm503_vm2, %v2032_v7, 0  ;;  %v2038_v13 = vpack.c.bf16 %v387_v9, %v387_v9 }
 0x141   : > { %v442_v14 = vpop.f32.mrf.mxu1  ;;  %1391 = vmatpush3.bf16.xpose.msra.mxu1 %v508_v12  ;;  %v384_v15 = vpop.f32.mrf.mxu0 }
 0x142   : > { %1402 = vmatprep.subr.bf16.mxu1 %v1795_v0 }
 0x143   : > { %v1381_v16 = vpop.f32.mrf.mxu1  ;;  %v1373_v17 = vpop.f32.mrf.mxu0 }
 0x144   : > { %614 = vrot.lane.b32.xlu0 %v2038_v13, %s1797_s1 }
 0x146   : > { %v496_v36 = vpop.f32.mrf.mxu0 }
 0x147   : > { %v2060_v42 = vpack.c.bf16 %v496_v36, %v496_v36 }
 0x148   : > { %1393 = vmatmul.mubr.msk.bf16.vlgmr.msra.gmra.mxu1 %vm503_vm2, %v2038_v13  ;;  %v1388_v37 = vpop.f32.mrf.mxu0 }
 0x149   : > { %1404 = vmatprep.mubr.msk.bf16.mxu1 %vm1796_vm0, %v1795_v0  ;;  %v568_v43 = vsel %vm566_vm4, %v2060_v42, 0 }
 0x14a   : > { %v499_v38 = vpop.f32.mrf.mxu0  ;;  %1397 = vmatpush3.bf16.msra.mxu0 %v568_v43 }
 0x14b   : > { %1408 = vmatprep.subr.bf16.mxu0 %v1795_v0 }
 0x14c   : > { %v1389_v39 = vpop.f32.mrf.mxu0 }
 0x1b2   : > { %v618_v20 = vpop.permute.xlu0 %617 }
 0x1b3   : > { %v623_v21 = vsel %vm503_vm2, %v618_v20, 0 }
 0x1b4   : > { %1403 = vmatpush3.bf16.xpose.msra.mxu1 %v623_v21 }
 0x1b5   : > { %1414 = vmatprep.subr.bf16.mxu1 %v1795_v0 }
 0x1b6   : > { %v615_v22 = vpop.permute.xlu0 %614 }
 0x1bb   : > { %1405 = vmatmul.mubr.msk.bf16.vlgmr.msra.gmra.mxu1 %vm503_vm2, %v615_v22 }
 0x1bc   : > { %1416 = vmatprep.mubr.msk.bf16.mxu1 %vm1796_vm0, %v1795_v0  ;;  %1415 = vmatpush3.bf16.msra.mxu1 %v1563_v53 }
 0x1bd   : > { %1426 = vmatprep.subr.bf16.mxu1 %v1795_v0 }
 0x208   : > { %v544_v23 = vpop.f32.mrf.mxu1 }
 0x209   : > { %v551_v24 = vsel %vm550_vm3, %v544_v23, -inf }
 0x20a   : > { %552 = vmax.xlane.f32.xlu1 %v551_v24  ;;  %v1394_v25 = vpop.f32.mrf.mxu1 }
 0x20c   : > { %v547_v26 = vpop.f32.mrf.mxu1 }
 0x20e   : > { %v1395_v27 = vpop.f32.mrf.mxu1 }
 0x27b   : > { %v659_v28 = vpop.f32.mrf.mxu1 }
 0x27c   : > { %v665_v29 = vsel %vm550_vm3, %v659_v28, -inf }
 0x27d   : > { %666 = vmax.xlane.f32.xlu1 %v665_v29  ;;  %v1406_v30 = vpop.f32.mrf.mxu1 }
 0x27f   : > { %v662_v31 = vpop.f32.mrf.mxu1 }
 0x281   : > { %v1407_v32 = vpop.f32.mrf.mxu1 }
 0x293   : > { %v553_v33 = vpop.xlane.xlu1 %552 }
 0x294   : > { %v554_v34 = vsub.f32 %v544_v23, %v553_v33 }
 0x296   : > { %v555_v35 = vmul.f32 1.442695, %v554_v34 }
 0x298   : > { %1566 = vpow2.f32 %v555_v35 }
 0x2a5   : > { %v1567_v40 = vpop.eup %1566 }
 0x2a6   : > { %v557_v41 = vsel %vm550_vm3, %v1567_v40, 0.0 }
 0x2a7   : > { %558 = vadd.xlane.f32.xlu0 %v557_v41 }
 0x2bd   : > { %890 = vrot.lane.b32.xlu0 %v2060_v42, %s1798_s28 }
 0x306   : > { %v667_v44 = vpop.xlane.xlu1 %666 }
 0x307   : > { %v668_v45 = vsub.f32 %v659_v28, %v667_v44 }
 0x309   : > { %v669_v46 = vmul.f32 1.442695, %v668_v45 }
 0x30b   : > { %1568 = vpow2.f32 %v669_v46 }
 0x318   : > { %v1569_v47 = vpop.eup %1568 }
 0x319   : > { %v671_v48 = vsel %vm550_vm3, %v1569_v47, 0.0 }
 0x31a   : > { %672 = vadd.xlane.f32.xlu1 %v671_v48 }
 0x32b   : > { %678 = vrot.lane.b32.xlu1 %v2060_v42, %s1797_s1  ;;  %s1720_s1 = scalar_lea.vmem %s1719_s20, 256 }
 0x32c   : > { %p1722_p2 = scmp.lt.s32.totalorder %s1720_s1, %s1714_s13 }
 0x32e   : > { %p1723_p9 = por %p1722_p2, %p1721_p12 }
 0x32f   : > { %830 = vrot.lane.b32.xlu1 %v2032_v7, %s1798_s28 }
 0x330   : > { %v559_v49 = vpop.xlane.xlu0 %558  ;;  %p1724_p11 = pnand %p1723_p9, %p1717_p0 }
 0x331   : > { %1570 = vrcp.f32 %v559_v49 }
 0x333   : > { %828 = vrot.lane.b32.xlu1 %v2038_v13, %s1798_s28 }
 0x334   : > { %v891_v61 = vpop.permute.xlu0 %890 }
 0x335   : > { %v896_v2 = vsel %vm566_vm4, %v891_v61, 0 }
 0x33e   : > { %v1571_v50 = vpop.eup %1570 }
 0x33f   : > { %v561_v51 = vmul.f32 %v1571_v50, %v1567_v40 }
 0x341   : > { %v562_v52 = vpack.c.bf16 %v561_v51, %v561_v51 }
 0x343   : > { %1399 = vmatmul.mubr.msk.bf16.vlgmr.msra.gmra.mxu0 %vm550_vm3, %v562_v52 }
 0x344   : > { %1410 = vmatprep.mubr.msk.bf16.mxu0 %vm1796_vm0, %v1795_v0 }
 0x3a3   : > { %v673_v54 = vpop.xlane.xlu1 %672 }
 0x3a4   : > { %1572 = vrcp.f32 %v673_v54 }
 0x3a7   : > { %v679_v55 = vpop.permute.xlu1 %678 }
 0x3a8   : > { %v684_v56 = vsel %vm566_vm4, %v679_v55, 0 }
 0x3a9   : > { %1409 = vmatpush3.bf16.msra.mxu0 %v684_v56  ;;  %v1565_v56 = vld [vmem:[#allocation10 + $0x18] sm:$0xff]  }
 0x3aa   : > { %1420 = vmatprep.subr.bf16.mxu0 %v1795_v0 }
 0x3ab   : > { %v831_v5 = vpop.permute.xlu1 %830 }
 0x3ac   : > { %v836_v10 = vsel %vm503_vm2, %v831_v5, 0 }
 0x3af   : > { %v829_v14 = vpop.permute.xlu1 %828 }
 0x3b1   : > { %v1573_v57 = vpop.eup %1572 }
 0x3b2   : > { %v675_v58 = vmul.f32 %v1573_v57, %v1569_v47 }
 0x3b4   : > { %v676_v60 = vpack.c.bf16 %v675_v58, %v675_v58 }
 0x3b6   : > { %1411 = vmatmul.mubr.msk.bf16.vlgmr.msra.gmra.mxu0 %vm550_vm3, %v676_v60 }
 0x3b7   : > { %1421 = vmatpush3.bf16.msra.mxu0 %v1562_v59  ;;  %1422 = vmatprep.mubr.msk.bf16.mxu0 %vm1796_vm0, %v1795_v0 }
 0x3b8   : > { %1432 = vmatprep.subr.bf16.mxu0 %v1795_v0 }
 0x403   : > { %v604_v62 = vpop.f32.mrf.mxu0 }
 0x404   : > { %v610_v63 = vpack.c.bf16 %v604_v62, %v604_v62 }
 0x405   : > { %v1400_v1 = vpop.f32.mrf.mxu0 }
 0x406   : > { %1423 = vmatmul.mubr.msk.bf16.vlgmr.msra.gmra.mxu0 %vm503_vm2, %v610_v63 }
 0x407   : > { %1433 = vmatpush3.bf16.msra.mxu0 %v896_v2  ;;  %v607_v3 = vpop.f32.mrf.mxu0  ;;  %1434 = vmatprep.mubr.msk.bf16.mxu0 %vm1796_vm0, %v1795_v0 }
 0x408   : > { %1444 = vmatprep.subr.bf16.mxu0 %v1795_v0 }
 0x409   : > { %v1401_v4 = vpop.f32.mrf.mxu0 }
 0x476   : > { %v720_v6 = vpop.f32.mrf.mxu0 }
 0x477   : > { %v726_v8 = vpack.c.bf16 %v720_v6, %v720_v6 }
 0x478   : > { %v1412_v9 = vpop.f32.mrf.mxu0 }
 0x479   : > { %1417 = vmatmul.mubr.msk.bf16.vlgmr.msra.gmra.mxu1 %vm503_vm2, %v726_v8 }
 0x47a   : > { %1427 = vmatpush3.bf16.xpose.msra.mxu1 %v836_v10  ;;  %v723_v11 = vpop.f32.mrf.mxu0  ;;  %1428 = vmatprep.mubr.msk.bf16.mxu1 %vm1796_vm0, %v1795_v0  ;;  %v1328_v10 = vld [vmem:[%s2176_s5] ss:$0 sm:$0xff] }
 0x47b   : > { %1438 = vmatprep.subr.bf16.mxu1 %v1795_v0 }
 0x47c   : > { %v1413_v12 = vpop.f32.mrf.mxu0 }
 0x481   : > { %1429 = vmatmul.mubr.msk.bf16.vlgmr.msra.gmra.mxu1 %vm503_vm2, %v829_v14 }
 0x482   : > { %1440 = vmatprep.mubr.msk.bf16.mxu1 %vm1796_vm0, %v1795_v0 }
 0x4c6   : > { %v822_v15 = vpop.f32.mrf.mxu0 }
 0x4c8   : > { %v1424_v16 = vpop.f32.mrf.mxu0 }
 0x4ca   : > { %v825_v17 = vpop.f32.mrf.mxu0 }
 0x4cc   : > { %v1425_v18 = vpop.f32.mrf.mxu0 }
 0x539   : > { %v773_v19 = vpop.f32.mrf.mxu1 }
 0x53b   : > { %v1418_v20 = vpop.f32.mrf.mxu1 }
 0x53d   : > { %v776_v21 = vpop.f32.mrf.mxu1 }
 0x53f   : > { %v1419_v22 = vpop.f32.mrf.mxu1 }
 0x541   : > { %v872_v23 = vpop.f32.mrf.mxu1 }
 0x542   : > { %v878_v24 = vsel %vm550_vm3, %v872_v23, -inf }
 0x543   : > { %879 = vmax.xlane.f32.xlu1 %v878_v24  ;;  %v1430_v25 = vpop.f32.mrf.mxu1 }
 0x545   : > { %v875_v26 = vpop.f32.mrf.mxu1 }
 0x547   : > { %v1431_v27 = vpop.f32.mrf.mxu1 }
 0x5cc   : > { %v880_v28 = vpop.xlane.xlu1 %879 }
 0x5cd   : > { %v881_v29 = vsub.f32 %v872_v23, %v880_v28 }
 0x5cf   : > { %v882_v30 = vmul.f32 1.442695, %v881_v29 }
 0x5d1   : > { %1574 = vpow2.f32 %v882_v30 }
 0x5de   : > { %v1575_v31 = vpop.eup %1574 }
 0x5df   : > { %v884_v32 = vsel %vm550_vm3, %v1575_v31, 0.0 }
 0x5e0   : > { %885 = vadd.xlane.f32.xlu0 %v884_v32 }
 0x5f6   : > { %994 = vrot.lane.b32.xlu0 %v2032_v7, %s1799_s11 }
 0x5fa   : > { %992 = vrot.lane.b32.xlu0 %v2038_v13, %s1799_s11  ;;  %v1564_v13 = vld [vmem:[#allocation10 + $0x10] sm:$0xff]  }
 0x5fb   : > { %1439 = vmatpush3.bf16.msra.mxu1 %v1564_v13 }
 0x5fc   : > { %1450 = vmatprep.subr.bf16.mxu1 %v1795_v0 }
 0x669   : > { %v886_v33 = vpop.xlane.xlu0 %885 }
 0x66a   : > { %1576 = vrcp.f32 %v886_v33 }
 0x66d   : > { %v995_v36 = vpop.permute.xlu0 %994 }
 0x66e   : > { %v1000_v38 = vsel %vm503_vm2, %v995_v36, 0 }
 0x671   : > { %v993_v7 = vpop.permute.xlu0 %992 }
 0x677   : > { %v1577_v34 = vpop.eup %1576 }
 0x678   : > { %v888_v35 = vmul.f32 %v1577_v34, %v1575_v31 }
 0x67a   : > { %v889_v37 = vpack.c.bf16 %v888_v35, %v888_v35 }
 0x67c   : > { %1435 = vmatmul.mubr.msk.bf16.vlgmr.msra.gmra.mxu0 %vm550_vm3, %v889_v37 }
 0x67d   : > { %1445 = vmatpush3.bf16.xpose.msra.mxu0 %v1000_v38  ;;  %1446 = vmatprep.mubr.msk.bf16.mxu0 %vm1796_vm0, %v1795_v0 }
 0x67e   : > { %1456 = vmatprep.subr.bf16.mxu0 %v1795_v0 }
 0x684   : > { %1447 = vmatmul.mubr.msk.bf16.vlgmr.msra.gmra.mxu0 %vm503_vm2, %v993_v7 }
 0x685   : > { %1458 = vmatprep.mubr.msk.bf16.mxu0 %vm1796_vm0, %v1795_v0  ;;  %1457 = vmatpush3.bf16.msra.mxu0 %v1565_v56 }
 0x73c   : > { %v932_v39 = vpop.f32.mrf.mxu0 }
 0x73d   : > { %v938_v40 = vpack.c.bf16 %v932_v39, %v932_v39 }
 0x73e   : > { %v1436_v41 = vpop.f32.mrf.mxu0 }
 0x73f   : > { %1441 = vmatmul.mubr.msk.bf16.vlgmr.msra.gmra.mxu1 %vm503_vm2, %v938_v40 }
 0x740   : > { %v935_v43 = vpop.f32.mrf.mxu0  ;;  %1452 = vmatprep.mubr.msk.bf16.mxu1 %vm1796_vm0, %v1795_v0  ;;  %v823_v0 = vadd.f32 %v822_v15, %v773_v19 }
 0x742   : > { %v1437_v44 = vpop.f32.mrf.mxu0 }
 0x744   : > { %v1036_v45 = vpop.f32.mrf.mxu0 }
 0x745   : > { %v1042_v46 = vsel %vm550_vm3, %v1036_v45, -inf }
 0x746   : > { %1043 = vmax.xlane.f32.xlu0 %v1042_v46  ;;  %v1448_v47 = vpop.f32.mrf.mxu0 }
 0x748   : > { %v1039_v48 = vpop.f32.mrf.mxu0 }
 0x74a   : > { %v1449_v49 = vpop.f32.mrf.mxu0 }
 0x7cf   : > { %v1044_v50 = vpop.xlane.xlu0 %1043 }
 0x7d0   : > { %v1045_v51 = vsub.f32 %v1036_v45, %v1044_v50 }
 0x7d2   : > { %v1046_v52 = vmul.f32 1.442695, %v1045_v51 }
 0x7d4   : > { %1578 = vpow2.f32 %v1046_v52 }
 0x7e1   : > { %v1579_v53 = vpop.eup %1578 }
 0x7e2   : > { %v1048_v54 = vsel %vm550_vm3, %v1579_v53, 0.0 }
 0x7e3   : > { %1049 = vadd.xlane.f32.xlu1 %v1048_v54 }
 0x7f4   : > { %1054 = vrot.lane.b32.xlu1 %v2060_v42, %s1799_s11 }
 0x7ff   : > { %v985_v55 = vpop.f32.mrf.mxu1 }
 0x800   : > { %v991_v57 = vadd.f32 %v985_v55, %v823_v0 }
 0x801   : > { %v1442_v58 = vpop.f32.mrf.mxu1 }
 0x803   : > { %v988_v59 = vpop.f32.mrf.mxu1 }
 0x805   : > { %v1443_v60 = vpop.f32.mrf.mxu1 }
 0x86c   : > { %v1050_v61 = vpop.xlane.xlu1 %1049 }
 0x86d   : > { %1580 = vrcp.f32 %v1050_v61 }
 0x870   : > { %v1055_v62 = vpop.permute.xlu1 %1054 }
 0x871   : > { %v1060_v63 = vsel %vm566_vm4, %v1055_v62, 0 }
 0x872   : > { %1451 = vmatpush3.bf16.msra.mxu1 %v1060_v63 }
 0x87a   : > { %v1581_v1 = vpop.eup %1580 }
 0x87b   : > { %v1052_v2 = vmul.f32 %v1581_v1, %v1579_v53 }
 0x87d   : > { %v1053_v3 = vpack.c.bf16 %v1052_v2, %v1052_v2 }
 0x87f   : > { %1453 = vmatmul.mubr.msk.bf16.vlgmr.msra.gmra.mxu1 %vm550_vm3, %v1053_v3 }
 0x93f   : > { %v1096_v42 = vpop.f32.mrf.mxu1 }
 0x940   : > { %v1102_v4 = vpack.c.bf16 %v1096_v42, %v1096_v42 }
 0x941   : > { %v1454_v5 = vpop.f32.mrf.mxu1 }
 0x942   : > { %1459 = vmatmul.mubr.msk.bf16.vlgmr.msra.gmra.mxu0 %vm503_vm2, %v1102_v4 }
 0x943   : > { %v1099_v6 = vpop.f32.mrf.mxu1 }
 0x945   : > { %v1455_v8 = vpop.f32.mrf.mxu1 }
 0xa02   : > { %v1149_v9 = vpop.f32.mrf.mxu0 }
 0xa03   : > { %v1155_v11 = vadd.f32 %v1149_v9, %v991_v57 }
 0xa04   : > { %v1460_v12 = vpop.f32.mrf.mxu0 }
 0xa05   : > { %v1163_v14 = vadd.f32 %v1328_v10, %v1155_v11 }
 0xa06   : > { %v1152_v15 = vpop.f32.mrf.mxu0 }
 0xa07   : > { %1164 = vst.msk [vmem:[%s324_s18] sm:$0xff] %vm343_vm1, %v1163_v14 }
 0xa08   : > { %v1461_v16 = vpop.f32.mrf.mxu0 }
 0xa09   : > { %1727 = shalt.err (!%p1724_p11)
}
 0xa0a   : > { %s1728_s28 = scalar_lea.hbm %s2127_s29, 128  ;;  %s1732_s26 = scalar_lea.hbm %s2177_s6, 256 }
 0xa0b   : > { %p1729_p13 = scmp.ne.s32.totalorder %s2127_s29, %s1728_s28  ;;  %p1733_p4 = scmp.lt.s32.totalorder %s2127_s29, %s2177_s6 }
 0xa0c   : > { %p1734_p6 = scmp.lt.s32.totalorder %s1732_s26, %s1728_s28 }
 0xa0d   : > { %p1730_p1 = pnand %p1729_p13, %p2197_p7 }
 0xa0e   : > { %p1735_p5 = por %p1734_p6, %p1733_p4 }
 0xa0f   : > { %p1731_p3 = pneg %p1730_p1 }
 0xa11   : > { %p1736_p8 = pnand %p1735_p5, %p1731_p3 }
 0xa13   : > { %1739 = shalt.err (!%p1736_p8)
}
 0xa14   : > { %1480 = dma.vmem_to_hbm [thread:$0]  (%p2197_p7), %s2129_s25, 128, %s2127_s29, %s1166_s27  }
 0xa15 PF: > { %s1191_s7 = sand.u32 1, %s1774_s21   ;;  %p2198_p10 = scmp.ne.s32.totalorder %s2189_s17, 0 }
 0xa16   : > { %p2199_p0 = scmp.ge.s32.totalorder %s1786_s24, 2  ;;  %s1192_s18 = scalar_lea.sflag [#allocation4], %s1191_s7 }
 0xa18   : > { %p1500_p12 = pnand %p2199_p0, %p2198_p10 }
 0xa1a   : > { %p1501_p2 = pneg %p1500_p12 }
 0xa1c   : > { %1769 = dma.done.wait (%p1501_p2), %s1192_s18, 128  }
 0xa1d   : > { %1771 = vsyncadd (%p1501_p2), %s1192_s18, 4294967168  ;;  %p21_p9 = scmp.ge.s32.totalorder %s1937_s9, 4   ;;  %s2200_s21 = smov %s1778_s22 }
 0xa1e   : > { %s2201_s22 = smov %s1782_s23  ;;  %s2202_s23 = smov %s1948_s14 }
 0xa1f   : > { %s2203_s24 = smov %s1937_s9  ;;  %23 = sbr.rel (!%p21_p9) target bundleno = 9 (0x9), region = 108 }
 0xa24   :  { %1197 = vsyncpa [#allocation3], 1 }
 0xa25   :  { %1199 = vsyncpa [#allocation3 + $0x1], 1 }
 0xa26   :  { %1200 = vsyncpa [#allocation6], 1 }
 0xa27   :  { %1201 = vsyncpa [#allocation9], 1 }
 0xa28   :  { %1202 = vsyncpa [#allocation4], 1 }
 0xa29   :  { %1204 = vsyncpa [#allocation4 + $0x1], 1 }

</bundles_post_ra>
